<compile_context>
chip_gen: v7x
topology: tpu7x:2x2x1
jax: 0.10.0
libtpu: 0.0.40
codegen_flags: <defaults>
</compile_context>

<pallas_src>
import functools

import jax
import jax.numpy as jnp
from jax.experimental import pallas as pl
from jax.experimental.pallas import tpu as pltpu


# ----------------------------- kernels ---------------------------------------


def _neck_pool_kernel(x_ref, w1_ref, b1_ref, w2_ref, b2_ref, o_ref, acc_ref, *, inv_hw):
    # x_ref:  (TM, C, THW)  NCHW tile (C on sublanes, HW chunk on lanes)
    # w1_ref: (C, HID)                     b1_ref: (1, HID)   f32
    # w2_ref: (HID, OUTP)                  b2_ref: (1, OUTP)  f32
    # o_ref:  (TM, OUTP)                   acc_ref: (TM, C)   f32 pooled-sum scratch
    j = pl.program_id(1)

    @pl.when(j == 0)
    def _():
        acc_ref[...] = jnp.zeros_like(acc_ref)

    # Lane reduce over the HW chunk; f32 accumulation across chunks.
    acc_ref[...] += jnp.sum(x_ref[...], axis=-1, dtype=jnp.float32)

    @pl.when(j == pl.num_programs(1) - 1)
    def _():
        pooled = (acc_ref[...] * inv_hw).astype(w1_ref.dtype)          # mean, MXU dtype
        h = jnp.dot(pooled, w1_ref[...], preferred_element_type=jnp.float32)
        h = jnp.maximum(h + b1_ref[...], 0.0).astype(w2_ref.dtype)
        out = jnp.dot(h, w2_ref[...], preferred_element_type=jnp.float32) + b2_ref[...]
        o_ref[...] = out.astype(o_ref.dtype)


def _neck_fc_kernel(x_ref, w1_ref, b1_ref, w2_ref, b2_ref, o_ref):
    # with_avg_pool=False path: x_ref is a (TM, C) tile of already-flattened features.
    x = x_ref[...].astype(w1_ref.dtype)
    h = jnp.dot(x, w1_ref[...], preferred_element_type=jnp.float32)
    h = jnp.maximum(h + b1_ref[...], 0.0).astype(w2_ref.dtype)
    out = jnp.dot(h, w2_ref[...], preferred_element_type=jnp.float32) + b2_ref[...]
    o_ref[...] = out.astype(o_ref.dtype)


# ----------------------------- tiling helpers ---------------------------------


def _cdiv(a, b):
    return -(-a // b)


def _round_up(x, m):
    return _cdiv(x, m) * m


def _vmem_caps():
    """(working-set budget, scoped vmem limit) in bytes, derived from the chip."""
    cap = 64 * 1024 * 1024                      # v7x per-TC floor (safe everywhere)
    try:
        cap = int(pltpu.get_tpu_info().vmem_capacity_bytes)
    except Exception:
        pass
    cap = max(32 * 1024 * 1024, min(cap, 128 * 1024 * 1024))
    return int(cap * 0.60), int(cap * 0.85)


def _pick_tm(n, cap=256):
    """Batch tile: == n, or a multiple of 8; >=2 tiles when n >= 16 (v7x megacore);
    balanced so the last (partial) tile wastes < one tile of work."""
    if n >= 16:
        cap = min(cap, _round_up(_cdiv(n, 2), 8))
    if n <= cap:
        return n
    tiles = _cdiv(n, cap)
    return min(cap, _round_up(_cdiv(n, tiles), 8))


def _plan_pool(n, c, hw, x_itemsize, out_p, out_itemsize, fixed_bytes, budget):
    """Pick (TM, THW) so that weights (single-buffered) + double-buffered x tile +
    f32 accumulator + double-buffered output fit the VMEM budget."""
    tm = _pick_tm(n)

    def fits(tm_, thw_):
        need = (fixed_bytes                                # weights/biases, 1 buffer
                + 2 * tm_ * c * thw_ * x_itemsize          # x tile, double-buffered
                + tm_ * c * 4                              # pooled f32 accumulator
                + 2 * tm_ * out_p * out_itemsize)          # output tile
        return need <= budget

    if fits(tm, hw):
        thw = hw
    elif hw % 128 == 0:
        # Largest multiple-of-128 divisor of HW that fits (exact division -> no
        # garbage lanes contaminate the reduction).
        cands = sorted((d for d in range(128, hw + 1, 128) if hw % d == 0), reverse=True)
        thw = next((d for d in cands if fits(tm, d)), 128)
    else:
        # TODO(synk): zero-pad HW to a 128-multiple if this single chunk over-fills VMEM.
        thw = hw
    while not fits(tm, thw) and tm >= 16:
        tm = _round_up(tm // 2, 8)
    return tm, thw


# ----------------------------- wrapper ----------------------------------------


def nonlinear_neck_v1(x, w1, b1, w2, b2, *, with_avg_pool=True,
                      block_m=None, block_hw=None):
    """Forward pass of NonLinearNeckV1.

    x : (N, C, H, W) if with_avg_pool else (N, C) (already-flattened features).
    w1: (C, HID), b1: (HID,), w2: (HID, OUT), b2: (OUT,)  -- (in, out) layout,
        i.e. transposed nn.Linear weights.
    Returns a single-element list [out], out: (N, OUT), matching PyTorch.
    """
    out_dtype = x.dtype
    c_in, hid = w1.shape
    out_ch = w2.shape[1]
    budget, vmem_limit = _vmem_caps()

    # Lane-dense output: pad fc2 output dim to a multiple of 128, slice afterwards.
    out_p = _round_up(out_ch, 128)
    if out_p != out_ch:
        w2 = jnp.pad(w2, ((0, 0), (0, out_p - out_ch)))
        b2 = jnp.pad(b2, ((0, out_p - out_ch),))
    b1_2d = b1.reshape(1, hid).astype(jnp.float32)
    b2_2d = b2.reshape(1, out_p).astype(jnp.float32)
    # TODO(synk): optionally cast f32 weights to bf16 here (halves weight VMEM, native
    # MXU rate on v6e/v7x) when the caller tolerates the rounding.

    w_bytes = (w1.size * w1.dtype.itemsize + w2.size * w2.dtype.itemsize
               + (hid + out_p) * 4)
    out_itemsize = jnp.dtype(out_dtype).itemsize

    if with_avg_pool:
        n, c, h, w = x.shape
        assert c == c_in
        hw = h * w
        x3 = x.reshape(n, c, hw)      # NCHW kept as-is: free reshape, no HBM relayout

        tm, thw = _plan_pool(n, c, hw, x.dtype.itemsize, out_p, out_itemsize,
                             w_bytes, budget)
        if block_m is not None:
            tm = block_m
        if block_hw is not None:
            thw = block_hw
        assert hw % thw == 0 and (thw % 128 == 0 or thw == hw)

        grid = (_cdiv(n, tm), hw // thw)
        cost = pl.CostEstimate(
            flops=2 * n * (c * hid + hid * out_p) + n * c * hw,
            transcendentals=0,
            bytes_accessed=(n * c * hw * x.dtype.itemsize + w_bytes
                            + n * out_p * out_itemsize),
        )
        kernel = functools.partial(_neck_pool_kernel, inv_hw=1.0 / float(hw))

        out = pl.pallas_call(
            kernel,
            out_shape=jax.ShapeDtypeStruct((n, out_p), out_dtype),
            grid_spec=pltpu.PrefetchScalarGridSpec(
                num_scalar_prefetch=0,
                grid=grid,
                in_specs=[
                    pl.BlockSpec((tm, c, thw), lambda i, j: (i, 0, j)),
                    pl.BlockSpec((c_in, hid), lambda i, j: (0, 0),
                                 pipeline_mode=pl.Buffered(1)),
                    pl.BlockSpec((1, hid), lambda i, j: (0, 0),
                                 pipeline_mode=pl.Buffered(1)),
                    pl.BlockSpec((hid, out_p), lambda i, j: (0, 0),
                                 pipeline_mode=pl.Buffered(1)),
                    pl.BlockSpec((1, out_p), lambda i, j: (0, 0),
                                 pipeline_mode=pl.Buffered(1)),
                ],
                out_specs=pl.BlockSpec((tm, out_p), lambda i, j: (i, 0)),
                scratch_shapes=[pltpu.VMEM((tm, c), jnp.float32)],
            ),
            compiler_params=pltpu.CompilerParams(
                dimension_semantics=("parallel", "arbitrary"),
                vmem_limit_bytes=vmem_limit,
            ),
            cost_estimate=cost,
        )(x3, w1, b1_2d, w2, b2_2d)
    else:
        n, c = x.shape
        assert c == c_in
        tm = _pick_tm(n) if block_m is None else block_m

        def fits(tm_):
            return (w_bytes + 2 * tm_ * c * x.dtype.itemsize
                    + 2 * tm_ * out_p * out_itemsize) <= budget

        while not fits(tm) and tm >= 16:
            tm = _round_up(tm // 2, 8)

        grid = (_cdiv(n, tm),)
        cost = pl.CostEstimate(
            flops=2 * n * (c * hid + hid * out_p),
            transcendentals=0,
            bytes_accessed=(n * c * x.dtype.itemsize + w_bytes
                            + n * out_p * out_itemsize),
        )
        out = pl.pallas_call(
            _neck_fc_kernel,
            out_shape=jax.ShapeDtypeStruct((n, out_p), out_dtype),
            grid_spec=pltpu.PrefetchScalarGridSpec(
                num_scalar_prefetch=0,
                grid=grid,
                in_specs=[
                    pl.BlockSpec((tm, c), lambda i: (i, 0)),
                    pl.BlockSpec((c_in, hid), lambda i: (0, 0),
                                 pipeline_mode=pl.Buffered(1)),
                    pl.BlockSpec((1, hid), lambda i: (0, 0),
                                 pipeline_mode=pl.Buffered(1)),
                    pl.BlockSpec((hid, out_p), lambda i: (0, 0),
                                 pipeline_mode=pl.Buffered(1)),
                    pl.BlockSpec((1, out_p), lambda i: (0, 0),
                                 pipeline_mode=pl.Buffered(1)),
                ],
                out_specs=pl.BlockSpec((tm, out_p), lambda i: (i, 0)),
            ),
            compiler_params=pltpu.CompilerParams(
                dimension_semantics=("parallel",),
                vmem_limit_bytes=vmem_limit,
            ),
            cost_estimate=cost,
        )(x, w1, b1_2d, w2, b2_2d)

    return [out[:, :out_ch]]


# ----------------------------- init + demo ------------------------------------


def _init_params(key, in_channels, hid_channels, out_channels, std=0.01):
    # Matches _init_weights(init_linear='normal', std=0.01, bias=0.0).
    k1, k2 = jax.random.split(key)
    w1 = jax.random.normal(k1, (in_channels, hid_channels), jnp.float32) * std
    b1 = jnp.zeros((hid_channels,), jnp.float32)
    w2 = jax.random.normal(k2, (hid_channels, out_channels), jnp.float32) * std
    b2 = jnp.zeros((out_channels,), jnp.float32)
    return w1, b1, w2, b2


if __name__ == "__main__":
    key = jax.random.PRNGKey(0)
    kx, kp, kq = jax.random.split(key, 3)

    # Small shapes consistent with the module: N=2, in_channels=4, spatial 16x16,
    # hid_channels=32, out_channels=16.
    N, C, H, W = 2, 4, 16, 16
    HID, OUT = 32, 16

    x = jax.random.normal(kx, (N, C, H, W), jnp.float32)   # NCHW (PyTorch convention)
    w1, b1, w2, b2 = _init_params(kp, C, HID, OUT)

    def ref_pool(x_):
        pooled = jnp.mean(x_, axis=(2, 3))
        return jnp.maximum(pooled @ w1 + b1, 0.0) @ w2 + b2

    # 1) with_avg_pool=True, auto-planned tiles (single HW chunk at these shapes).
    out = nonlinear_neck_v1(x, w1, b1, w2, b2, with_avg_pool=True)[0]
    out = jax.block_until_ready(out)
    assert out.shape == (N, OUT)
    assert jnp.allclose(out, ref_pool(x), atol=1e-5, rtol=1e-5)

    # 2) with_avg_pool=True, forced multi-step HW reduction + partial batch tile,
    #    exercising the accumulator / pl.when path and boundary-block handling.
    x_big = jax.random.normal(kq, (10, C, H, W), jnp.float32)
    out_b = nonlinear_neck_v1(x_big, w1, b1, w2, b2, with_avg_pool=True,
                              block_m=8, block_hw=128)[0]
    out_b = jax.block_until_ready(out_b)
    assert out_b.shape == (10, OUT)
    assert jnp.allclose(out_b, ref_pool(x_big), atol=1e-5, rtol=1e-5)

    # 3) with_avg_pool=False path (already-flattened (N, C) features).
    x2 = jax.random.normal(jax.random.PRNGKey(1), (N, C), jnp.float32)
    out2 = nonlinear_neck_v1(x2, w1, b1, w2, b2, with_avg_pool=False)[0]
    out2 = jax.block_until_ready(out2)
    ref2 = jnp.maximum(x2 @ w1 + b1, 0.0) @ w2 + b2
    assert out2.shape == (N, OUT)
    assert jnp.allclose(out2, ref2, atol=1e-5, rtol=1e-5)

    print("KERNEL_OK")
</pallas_src>

<mosaic_0001>
module attributes {stable_mosaic.version = 11 : i64} {
  func.func @_neck_pool_kernel(%arg0: i32, %arg1: i32, %arg2: memref<2x4x256xf32, #tpu.memory_space<vmem>>, %arg3: memref<4x32xf32, #tpu.memory_space<vmem>>, %arg4: memref<1x32xf32, #tpu.memory_space<vmem>>, %arg5: memref<32x128xf32, #tpu.memory_space<vmem>>, %arg6: memref<1x128xf32, #tpu.memory_space<vmem>>, %arg7: memref<2x128xf32, #tpu.memory_space<vmem>>, %arg8: memref<2x4xf32, #tpu.memory_space<vmem>>) attributes {dimension_semantics = [#tpu.dimension_semantics<parallel>, #tpu.dimension_semantics<arbitrary>], iteration_bounds = array<i64: 1, 1>, scalar_prefetch = 0 : i64, scratch_operands = 1 : i64, tpu.core_type = #tpu.core_type<tc>, window_params = [{transform_indices = @transform_0, window_bounds = array<i64: 2, 4, 256>}, {pipeline_mode = #tpu.pipeline_mode<synchronous>, transform_indices = @transform_1, window_bounds = array<i64: 4, 32>}, {pipeline_mode = #tpu.pipeline_mode<synchronous>, transform_indices = @transform_2, window_bounds = array<i64: 1, 32>}, {pipeline_mode = #tpu.pipeline_mode<synchronous>, transform_indices = @transform_3, window_bounds = array<i64: 32, 128>}, {pipeline_mode = #tpu.pipeline_mode<synchronous>, transform_indices = @transform_4, window_bounds = array<i64: 1, 128>}, {transform_indices = @transform_5, window_bounds = array<i64: 2, 128>}]} {
    %c0_i32 = arith.constant 0 : i32
    %0 = arith.cmpi eq, %arg1, %c0_i32 : i32
    %1 = arith.extui %0 : i1 to i32
    %c0_i32_0 = arith.constant 0 : i32
    %2 = arith.cmpi ne, %1, %c0_i32_0 : i32
    scf.if %2 {
      %cst_9 = arith.constant 0.000000e+00 : f32
      %11 = vector.broadcast %cst_9 : f32 to vector<2x4xf32>
      %c0_10 = arith.constant 0 : index
      %c0_11 = arith.constant 0 : index
      %12 = vector.load %arg8[%c0_10, %c0_11] : memref<2x4xf32, #tpu.memory_space<vmem>>, vector<2x4xf32>
      tpu.vector_store %arg8[%c0_10, %c0_11], %11 {strides = array<i32>} : memref<2x4xf32, #tpu.memory_space<vmem>>, vector<2x4xf32>,
    } else {
    }
    %c0 = arith.constant 0 : index
    %c0_1 = arith.constant 0 : index
    %3 = vector.load %arg8[%c0, %c0_1] : memref<2x4xf32, #tpu.memory_space<vmem>>, vector<2x4xf32>
    %c0_2 = arith.constant 0 : index
    %c0_3 = arith.constant 0 : index
    %c0_4 = arith.constant 0 : index
    %4 = vector.load %arg2[%c0_2, %c0_3, %c0_4] : memref<2x4x256xf32, #tpu.memory_space<vmem>>, vector<2x4x256xf32>
    %cst = arith.constant dense<0.000000e+00> : vector<2x4xf32>
    %5 = vector.multi_reduction <add>, %4, %cst [2] : vector<2x4x256xf32> to vector<2x4xf32>
    %6 = arith.addf %3, %5 : vector<2x4xf32>
    %c0_5 = arith.constant 0 : index
    %c0_6 = arith.constant 0 : index
    %7 = vector.load %arg8[%c0_5, %c0_6] : memref<2x4xf32, #tpu.memory_space<vmem>>, vector<2x4xf32>
    tpu.vector_store %arg8[%c0_5, %c0_6], %6 {strides = array<i32>} : memref<2x4xf32, #tpu.memory_space<vmem>>, vector<2x4xf32>,
    %c0_i32_7 = arith.constant 0 : i32
    %8 = arith.cmpi eq, %arg1, %c0_i32_7 : i32
    %9 = arith.extui %8 : i1 to i32
    %c0_i32_8 = arith.constant 0 : i32
    %10 = arith.cmpi ne, %9, %c0_i32_8 : i32
    scf.if %10 {
      %c0_9 = arith.constant 0 : index
      %c0_10 = arith.constant 0 : index
      %11 = vector.load %arg8[%c0_9, %c0_10] : memref<2x4xf32, #tpu.memory_space<vmem>>, vector<2x4xf32>
      %cst_11 = arith.constant 3.906250e-03 : f32
      %12 = vector.broadcast %cst_11 : f32 to vector<2x4xf32>
      %13 = arith.mulf %11, %12 : vector<2x4xf32>
      %c0_12 = arith.constant 0 : index
      %c0_13 = arith.constant 0 : index
      %14 = vector.load %arg3[%c0_12, %c0_13] : memref<4x32xf32, #tpu.memory_space<vmem>>, vector<4x32xf32>
      %cst_14 = arith.constant dense<0.000000e+00> : vector<2x32xf32>
      %15 = tpu.matmul %13, %14, %cst_14 {dimension_numbers = #tpu.dot_dimension_numbers<[1], [0], [0], [1], [0, 0, 1, 1], [], []>} : vector<2x4xf32>, vector<4x32xf32>, vector<2x32xf32> -> vector<2x32xf32>
      %c0_15 = arith.constant 0 : index
      %c0_16 = arith.constant 0 : index
      %16 = vector.load %arg4[%c0_15, %c0_16] : memref<1x32xf32, #tpu.memory_space<vmem>>, vector<1x32xf32>
      %17 = vector.broadcast %16 : vector<1x32xf32> to vector<2x32xf32>
      %18 = arith.addf %15, %17 : vector<2x32xf32>
      %cst_17 = arith.constant 0.000000e+00 : f32
      %19 = vector.broadcast %cst_17 : f32 to vector<2x32xf32>
      %20 = arith.maximumf %18, %19 : vector<2x32xf32>
      %c0_18 = arith.constant 0 : index
      %c0_19 = arith.constant 0 : index
      %21 = vector.load %arg5[%c0_18, %c0_19] : memref<32x128xf32, #tpu.memory_space<vmem>>, vector<32x128xf32>
      %cst_20 = arith.constant dense<0.000000e+00> : vector<2x128xf32>
      %22 = tpu.matmul %20, %21, %cst_20 {dimension_numbers = #tpu.dot_dimension_numbers<[1], [0], [0], [1], [0, 0, 1, 1], [], []>} : vector<2x32xf32>, vector<32x128xf32>, vector<2x128xf32> -> vector<2x128xf32>
      %c0_21 = arith.constant 0 : index
      %c0_22 = arith.constant 0 : index
      %23 = vector.load %arg6[%c0_21, %c0_22] : memref<1x128xf32, #tpu.memory_space<vmem>>, vector<1x128xf32>
      %24 = vector.broadcast %23 : vector<1x128xf32> to vector<2x128xf32>
      %25 = arith.addf %22, %24 : vector<2x128xf32>
      %c0_23 = arith.constant 0 : index
      %c0_24 = arith.constant 0 : index
      %26 = vector.load %arg7[%c0_23, %c0_24] : memref<2x128xf32, #tpu.memory_space<vmem>>, vector<2x128xf32>
      tpu.vector_store %arg7[%c0_23, %c0_24], %25 {strides = array<i32>} : memref<2x128xf32, #tpu.memory_space<vmem>>, vector<2x128xf32>,
    } else {
    }
    return
  }
  func.func @transform_0(%arg0: i32, %arg1: i32) -> (i32, i32, i32) {
    %c0_i32 = arith.constant 0 : i32
    %c0_i32_0 = arith.constant 0 : i32
    return %arg0, %c0_i32, %arg1 : i32, i32, i32
  }
  func.func @transform_1(%arg0: i32, %arg1: i32) -> (i32, i32) {
    %c0_i32 = arith.constant 0 : i32
    %c0_i32_0 = arith.constant 0 : i32
    %c0_i32_1 = arith.constant 0 : i32
    return %c0_i32, %c0_i32_0 : i32, i32
  }
  func.func @transform_2(%arg0: i32, %arg1: i32) -> (i32, i32) {
    %c0_i32 = arith.constant 0 : i32
    %c0_i32_0 = arith.constant 0 : i32
    %c0_i32_1 = arith.constant 0 : i32
    return %c0_i32, %c0_i32_0 : i32, i32
  }
  func.func @transform_3(%arg0: i32, %arg1: i32) -> (i32, i32) {
    %c0_i32 = arith.constant 0 : i32
    %c0_i32_0 = arith.constant 0 : i32
    %c0_i32_1 = arith.constant 0 : i32
    return %c0_i32, %c0_i32_0 : i32, i32
  }
  func.func @transform_4(%arg0: i32, %arg1: i32) -> (i32, i32) {
    %c0_i32 = arith.constant 0 : i32
    %c0_i32_0 = arith.constant 0 : i32
    %c0_i32_1 = arith.constant 0 : i32
    return %c0_i32, %c0_i32_0 : i32, i32
  }
  func.func @transform_5(%arg0: i32, %arg1: i32) -> (i32, i32) {
    %c0_i32 = arith.constant 0 : i32
    %c0_i32_0 = arith.constant 0 : i32
    return %arg0, %c0_i32 : i32, i32
  }
}

</mosaic_0001>

<bundles_post_ra>
// kernel: tpu_custom_call.1
= control target key start
LH: loop header
LB: loop body
LE: loop exit
PB: predicated region body
PF: predicated region fallthrough
CT: control target
= control target key end

     0   :  { %10 = vsyncpa [#allocation4], 0  ;;  %s543_s0 = inlined_call_operand.hbm [shape: f32[2,4,256], index: 0, kind: input, shape index: {}]   ;;  %s544_s1 = inlined_call_operand.hbm [shape: f32[4,32], index: 1, kind: input, shape index: {}]   ;;  %s545_s2 = inlined_call_operand.vmem [shape: f32[1,32], index: 2, kind: input, shape index: {}]   ;;  %s546_s3 = inlined_call_operand.hbm [shape: f32[32,128], index: 3, kind: input, shape index: {}]   ;;  %s547_s4 = inlined_call_operand.vmem [shape: f32[1,128], index: 4, kind: input, shape index: {}]   ;;  %s548_s5 = inlined_call_operand.hbm [shape: f32[2,128], index: 5, kind: output, shape index: {}]  }
   0x1   :  { %11 = vsyncpa [#allocation7], 0 }
   0x2   :  { %12 = vsyncpa [#allocation5], 0  ;;  %s436_s18 = smov [#allocation6]   ;;  %s437_s20 = smov [#allocation3]  }
   0x3   :  { %s31_s19 = sshll.u32 %s436_s18, 4  ;;  %s18_s21 = sshll.u32 %s437_s20, 4  ;;  %s32_s19 = int_to_ptr.vmem [resolvable:$true] %s31_s19  ;;  %s475_s21 = int_to_ptr.vmem [resolvable:$true] %s18_s21 }
   0x4   :  { %s342_s24 = scalar_lea.hbm %s544_s1, 64 }
   0x5   :  { %p343_p0 = scmp.ne.s32.totalorder %s544_s1, %s342_s24  ;;  %p346_p1 = scmp.lt.u32.totalorder %s342_s24, %s544_s1 }
   0x7   :  { %p348_p2 = pnand %p346_p1, %p343_p0 }
   0x9   :  { %351 = shalt.err (!%p348_p2)
}
   0xa   :  { %s352_s29 = scalar_lea.vmem %s32_s19, 64  ;;  %p357_p4 = scmp.lt.s32.totalorder %s32_s19, %s32_s19 }
   0xb   :  { %p353_p3 = scmp.ne.s32.totalorder %s32_s19, %s352_s29  ;;  %p358_p5 = scmp.lt.s32.totalorder %s352_s29, %s352_s29 }
   0xd   :  { %p359_p6 = por %p358_p5, %p357_p4 }
   0xf   :  { %p360_p7 = pnand %p359_p6, %p353_p3 }
  0x11   :  { %363 = shalt.err (!%p360_p7)
}
  0x12   :  { %34 = dma.hbm_to_vmem [thread:$0]  %s544_s1, 64, %s32_s19, [#allocation7]  }
  0x13   :  { %s364_s9 = scalar_lea.hbm %s543_s0, 256 }
  0x14   :  { %p365_p8 = scmp.ne.s32.totalorder %s543_s0, %s364_s9  ;;  %p368_p9 = scmp.lt.u32.totalorder %s364_s9, %s543_s0 }
  0x16   :  { %p370_p10 = pnand %p368_p9, %p365_p8 }
  0x18   :  { %373 = shalt.err (!%p370_p10)
}
  0x19   :  { %s374_s14 = scalar_lea.vmem %s475_s21, 256  ;;  %p379_p12 = scmp.lt.s32.totalorder %s475_s21, %s475_s21 }
  0x1a   :  { %p375_p11 = scmp.ne.s32.totalorder %s475_s21, %s374_s14  ;;  %p380_p13 = scmp.lt.s32.totalorder %s374_s14, %s374_s14 }
  0x1c   :  { %p381_p0 = por %p380_p13, %p379_p12 }
  0x1e   :  { %p382_p1 = pnand %p381_p0, %p375_p11 }
  0x20   :  { %385 = shalt.err (!%p382_p1)
}
  0x21   :  { %s438_s1 = smov 128   ;;  %s439_s15 = smov 8  }
  0x22   :  { %24 = dma.hbm_to_vmem [thread:$0]  %s543_s0, 256, %s475_s21, [#allocation4], %s438_s1, %s438_s1, %s439_s15  }
  0x23   :  { %s440_s18 = smov [#allocation8]   ;;  %s386_s23 = scalar_lea.hbm %s546_s3, 512 }
  0x24   :  { %s42_s19 = sshll.u32 %s440_s18, 4  ;;  %p387_p2 = scmp.ne.s32.totalorder %s546_s3, %s386_s23  ;;  %s43_s19 = int_to_ptr.vmem [resolvable:$true] %s42_s19 }
  0x25   :  { %p390_p3 = scmp.lt.u32.totalorder %s386_s23, %s546_s3 }
  0x27   :  { %p392_p4 = pnand %p390_p3, %p387_p2 }
  0x29   :  { %395 = shalt.err (!%p392_p4)
}
  0x2a   :  { %s396_s28 = scalar_lea.vmem %s43_s19, 512  ;;  %p401_p6 = scmp.lt.s32.totalorder %s43_s19, %s43_s19 }
  0x2b   :  { %p397_p5 = scmp.ne.s32.totalorder %s43_s19, %s396_s28  ;;  %p402_p7 = scmp.lt.s32.totalorder %s396_s28, %s396_s28 }
  0x2d   :  { %p403_p8 = por %p402_p7, %p401_p6 }
  0x2f   :  { %p404_p9 = pnand %p403_p8, %p397_p5 }
  0x31   :  { %407 = shalt.err (!%p404_p9)
}
  0x32   :  { %48 = dma.hbm_to_vmem [thread:$0]  %s546_s3, 512, %s43_s19, [#allocation7], %s438_s1, %s438_s1, %s439_s15  }
  0x33   :  { %430 = dma.done.wait [#allocation4], 256  }
  0x34   :  { %431 = vsyncadd [#allocation4], 4294967040 }
  0x35   :  { %432 = dma.done.wait [#allocation7], 576  }
  0x36   :  { %433 = vsyncadd [#allocation7], 4294966720  ;;  %vm75_vm0 = vcmask 1043456   ;;  %v67_v0 = vld [vmem:[#allocation3] sm:$0xff]  ;;  %v68_v1 = vld [vmem:[#allocation3 + $0x8] sm:$0xff]  ;;  %vm64_vm1 = vcmask 25600   ;;  %v88_v16 = vlaneseq }
  0x37   :  { %v71_v2 = vcombine.high %v67_v0, %v67_v0  ;;  %v76_v3 = vsel %vm75_vm0, %v67_v0, 0.0  ;;  %v72_v4 = vcombine.high %v68_v1, %v68_v1  ;;  %v81_v6 = vsel %vm75_vm0, %v68_v1, 0.0  ;;  %v109_v11 = vld [vmem:[#allocation6] sm:$0xf]  ;;  %v195_v12 = vld [vmem:[#allocation8] sm:$0xff]  ;;  %v196_v13 = vld [vmem:[#allocation8 + $0x8] sm:$0xff] }
  0x38   :  { %v441_v10 = vmov 0.0   ;;  %vm442_vm2 = vmmov 0   ;;  %v443_v14 = vmov 0.0|0.0   ;;  %v326_v15 = vpack.c.bf16 %v196_v13, %v195_v12  ;;  %v197_v29 = vld [vmem:[#allocation8 + $0x10] sm:$0xff]  ;;  %v198_v30 = vld [vmem:[#allocation8 + $0x18] sm:$0xff]  ;;  %s444_s7 = smov [#allocation9]  }
  0x39   :  { %v77_v5 = vsel %vm75_vm0, %v71_v2, 0.0  ;;  %v82_v7 = vsel %vm75_vm0, %v72_v4, 0.0  ;;  %65 = vst.msk [vmem:[#allocation2] sm:$0x3] %vm64_vm1, %v441_v10  ;;  %309 = vmatprep.subr.mxu0 %v441_v10  ;;  %311 = vmatprep.mubr.msk.f32.mxu0 %vm442_vm2, %v441_v10  ;;  %v89_v17 = vand.u32 127, %v88_v16  ;;  %v91_v18 = vshrl.u32 %v88_v16, 7 }
  0x3a   :  { %v78_v8 = vadd.f32 %v77_v5, %v76_v3  ;;  %v83_v9 = vadd.f32 %v82_v7, %v81_v6  ;;  %310 = vmatpush3.msk.msra.mxu0 %vm75_vm0, %v109_v11  ;;  %322 = vmatprep.mubr.msk.f32.mxu1 %vm442_vm2, %v441_v10  ;;  %vm98_vm3 = vcmask 1041409   ;;  %vm117_vm4 = vcmask 31744   ;;  %v297_v32 = vld [vmem:[%s545_s2] ss:$0 sm:$0xff]  ;;  %s287_s8 = sshll.u32 %s444_s7, 4  ;;  %s288_s8 = int_to_ptr.vmem [resolvable:$true] %s287_s8 }
  0x3b   :  { %325 = vmatprep.subr.bf16.mxu1 %v443_v14  ;;  %v92_v20 = vsub.s32 %v89_v17, %v91_v18  ;;  %v329_v31 = vpack.c.bf16 %v198_v30, %v197_v29  ;;  %vm206_vm5 = vcmask 261120   ;;  %v300_v37 = vld [vmem:[%s547_s4] ss:$0 sm:$0xff]  ;;  %s408_s9 = scalar_lea.vmem %s288_s8, 32  ;;  %p413_p11 = scmp.lt.s32.totalorder %s288_s8, %s288_s8 }
  0x3c   :  { %79 = vadd.xlane.f32.xlu0 %v78_v8  ;;  %327 = vmatpush3.bf16.msra.mxu1 %v326_v15  ;;  %p409_p10 = scmp.ne.s32.totalorder %s288_s8, %s408_s9  ;;  %p414_p12 = scmp.lt.s32.totalorder %s408_s9, %s408_s9 }
  0x3d   :  { %328 = vmatprep.subr.bf16.mxu1 %v443_v14 }
  0x3e   :  { %p415_p13 = por %p414_p12, %p413_p11 }
  0x40   :  { %84 = vadd.xlane.f32.xlu0 %v83_v9  ;;  %v66_v24 = vld [vmem:[#allocation2] sm:$0x3]  ;;  %330 = vmatpush3.bf16.msra.mxu1 %v329_v31  ;;  %p416_p0 = pnand %p415_p13, %p409_p10 }
  0xc9   :  { %v80_v19 = vpop.xlane.xlu0 %79 }
  0xca   :  { %v93_v22 = vrot.slane %v80_v19, %v92_v20 }
  0xcd   :  { %v85_v21 = vpop.xlane.xlu0 %84 }
  0xce   :  { %v97_v23 = vrot.slane %v85_v21, %v92_v20 }
  0xd0   :  { %v99_v25 = vsel %vm98_vm3, %v97_v23, %v93_v22 }
  0xd1   :  { %v101_v26 = vadd.f32 %v99_v25, %v66_v24 }
  0xd3   :  { %103 = vst.msk [vmem:[#allocation2] sm:$0x3] %vm64_vm1, %v101_v26 }
  0xda   :  { %v107_v27 = vld [vmem:[#allocation2] sm:$0x3] }
  0xdb   :  { %v108_v28 = vmul.f32 0.00390625, %v107_v27 }
  0xdd   :  { %312 = vmatmul.mubr.msk.f32.vlgmr.msra.gmra.mrb[0].mxu0 %vm117_vm4, %v108_v28 }
 0x1b0   :  { %v190_v33 = vpop.f32.mrb[0].mxu0 }
 0x1b1   :  { %v191_v34 = vadd.f32 %v297_v32, %v190_v33  ;;  %v313_v35 = vpop.f32.mrb[1].mxu0 }
 0x1b3   :  { %v194_v36 = vmax.f32 %v191_v34, 0.0 }
 0x1b5   :  { %323 = vmatmul.mubr.msk.f32.vlgmr.msra.gmra.mrb[0].mxu1 %vm206_vm5, %v194_v36 }
 0x288   :  { %v276_v38 = vpop.f32.mrb[0].mxu1 }
 0x289   :  { %v277_v39 = vadd.f32 %v300_v37, %v276_v38  ;;  %v324_v40 = vpop.f32.mrb[1].mxu1 }
 0x28b   :  { %280 = vst [vmem:[#allocation9] sm:$0x3] %v277_v39 }
 0x28c   :  { %419 = shalt.err (!%p416_p0)
}
 0x28d   :  { %s420_s11 = scalar_lea.hbm %s548_s5, 32 }
 0x28e   :  { %p421_p1 = scmp.ne.s32.totalorder %s548_s5, %s420_s11  ;;  %p424_p2 = scmp.lt.u32.totalorder %s420_s11, %s548_s5 }
 0x290   :  { %p426_p3 = pnand %p424_p2, %p421_p1 }
 0x292   :  { %429 = shalt.err (!%p426_p3)
}
 0x293   :  { %290 = dma.vmem_to_hbm [thread:$0]  %s288_s8, 32, %s548_s5, [#allocation5]  }
 0x294   :  { %434 = dma.done.wait [#allocation5], 32  }
 0x295   :  { %435 = vsyncadd [#allocation5], 4294967264 }
 0x296   :  { %294 = vsyncpa [#allocation4], 1 }
 0x297   :  { %295 = vsyncpa [#allocation7], 1 }
 0x298   :  { %296 = vsyncpa [#allocation5], 1 }

</bundles_post_ra>
